<compile_context>
chip_gen: v6e
topology: v6e:2x2x1
jax: 0.10.0
libtpu: 0.0.40
codegen_flags: <defaults>
</compile_context>

<pallas_src>
import functools

import jax
import jax.numpy as jnp
from jax import lax
from jax.experimental import pallas as pl
from jax.experimental.pallas import tpu as pltpu


def _cross_attn_kernel(q_ref, k_ref, v_ref, out_ref, attn_ref, *, scale,
                       exp_dtype):
    # q_ref: (bt, cb, tq)   k_ref: (bt, cb, Nk)   v_ref: (bt, c, Nk)
    # out_ref: (bt, c, tq)  attn_ref: (bt, tq, Nk)
    q = q_ref[...]            # native dtype -> MXU bf16 path stays bf16
    k = k_ref[...]
    v = v_ref[...]

    # sim[b, i, j] = sum_d q[b, d, i] * k[b, d, j]  (contract the channel axis)
    sim = lax.dot_general(
        q, k, (((1,), (1,)), ((0,), (0,))),
        preferred_element_type=jnp.float32) * scale         # (bt, tq, Nk) f32

    # Numerically-stable softmax over the last (lane) axis.
    mx = jnp.max(sim, axis=-1, keepdims=True)
    if exp_dtype == jnp.float32:
        e = jnp.exp(sim - mx)                                # f32 EUP (v5e-safe)
    else:
        # bf16 EUP path (~2x rate) on v6e/v7x, only taken for bf16 inputs.
        e = jnp.exp((sim - mx).astype(exp_dtype)).astype(jnp.float32)
    denom = jnp.sum(e, axis=-1, keepdims=True)               # f32 accumulation
    # Exact reciprocal + multiply instead of a full (tq, Nk) divide; denom is
    # only (bt, tq, 1).  approx=True would trade ~2^-12 relative error, which
    # the 1e-5 self-test tolerance does not allow.
    attn_f32 = e * pl.reciprocal(denom)

    attn_ref[...] = attn_f32.astype(attn_ref.dtype)

    # out[b, d, i] = sum_j v[b, d, j] * attn[b, i, j] -> channel-major (c, tq).
    out = lax.dot_general(
        v, attn_f32.astype(v.dtype), (((2,), (2,)), ((0,), (0,))),
        preferred_element_type=jnp.float32)                  # (bt, c, tq)
    out_ref[...] = out.astype(out_ref.dtype)


def _vmem_budget_bytes():
    """(block/scratch budget, Mosaic vmem_limit, device_kind), generation-gated."""
    try:
        kind = jax.devices()[0].device_kind.lower()
    except Exception:
        kind = ""
    if "v5" in kind or "v6" in kind:
        # 128 MiB physical VMEM: use the headroom for bigger tiles instead of
        # leaving >75% idle behind the 32 MiB scoped default.
        return 56 * 1024 * 1024, 96 * 1024 * 1024, kind
    # v7x (64 MiB physical) and unknown devices: stay conservative.
    return 24 * 1024 * 1024, 32 * 1024 * 1024, kind


def _choose_tiles(B, Nq, Nk, cb, c, qkv_itemsize, out_itemsize, attn_itemsize,
                  vmem_budget_bytes, max_bt=8):
    """Pick (bt, tq).

    tq tiles the query axis; it must be a multiple of 128 (satisfies the
    (8,128) BlockSpec rule and keeps q/out stores lane-dense) or equal Nq.
    bt batch elements per step amortize the ~0.35 us per-step overhead.
    VMEM accounting covers every block at its real dtype x2 (double
    buffering) plus the f32 softmax intermediates live inside one step.
    We prefer >= 4 total grid steps so dual-TensorCore parts (v7x) get
    >= 2 steps per core and the attn writeback stays pipelined.
    """
    tq_cands = {Nq}
    t = 128
    while t < Nq:
        if Nq % t == 0:
            tq_cands.add(t)
        t += 128
    tq_cands = sorted(tq_cands, reverse=True)     # biggest tile first

    def step_bytes(bt, tq):
        blocks = (bt * cb * tq * qkv_itemsize       # q
                  + bt * cb * Nk * qkv_itemsize     # k
                  + bt * c * Nk * qkv_itemsize      # v
                  + bt * c * tq * out_itemsize      # out
                  + bt * tq * Nk * attn_itemsize)   # attn (dominant stream)
        interm = 3 * bt * tq * Nk * 4               # sim / exp / f32 attn
        return 2 * blocks + interm                  # every block double-buffered

    tq = tq_cands[-1]
    for cand_tq in tq_cands:                        # largest tq that fits @ bt=1
        if step_bytes(1, cand_tq) <= vmem_budget_bytes:
            tq = cand_tq
            break

    target_steps = min(4, B * (Nq // tq))
    bt = 1
    for cand_bt in range(min(B, max_bt), 0, -1):
        if B % cand_bt:                             # no partial batch blocks
            continue
        if step_bytes(cand_bt, tq) > vmem_budget_bytes:
            continue
        if (B // cand_bt) * (Nq // tq) >= target_steps:
            bt = cand_bt
            break
    return bt, tq


def cross_attention2(reference_blocks, reference_feat_blocks,
                     target_feat_blocks, dim_feat=32):
    assert reference_feat_blocks.shape[:2] == target_feat_blocks.shape[:2]
    b, m, c, x_h, x_w = reference_blocks.shape
    _, _, cb, x1_h, x1_w = reference_feat_blocks.shape
    _, _, cb2, x2_h, x2_w = target_feat_blocks.shape
    assert cb == cb2

    B = b * m
    Nq = x2_h * x2_w          # query tokens
    Nk = x1_h * x1_w          # key tokens
    Nv = x_h * x_w            # value tokens
    assert Nv == Nk, "attn @ v requires reference spatial == reference-feat spatial"
    assert Nq == Nv, "output rearrange requires query spatial == reference spatial"
    scale = float(dim_feat) ** (-0.5)

    # Channel-major 'b c (x y)' layouts: pure reshapes, no XLA transposes.
    q = target_feat_blocks.reshape(B, cb, Nq)
    k = reference_feat_blocks.reshape(B, cb, Nk)
    v = reference_blocks.reshape(B, c, Nv)

    attn_dtype = jnp.promote_types(q.dtype, k.dtype)   # torch softmax keeps sim dtype
    out_dtype = jnp.promote_types(attn_dtype, v.dtype)

    budget, vmem_limit, kind = _vmem_budget_bytes()
    bt, tq = _choose_tiles(
        B, Nq, Nk, cb, c,
        qkv_itemsize=max(jnp.dtype(q.dtype).itemsize, jnp.dtype(v.dtype).itemsize),
        out_itemsize=jnp.dtype(out_dtype).itemsize,
        attn_itemsize=jnp.dtype(attn_dtype).itemsize,
        vmem_budget_bytes=budget)

    # bf16 exp only where the EUP has a bf16 path (v6e / v7x), never on v5e.
    exp_dtype = (jnp.bfloat16
                 if (attn_dtype == jnp.bfloat16 and "v5" not in kind)
                 else jnp.float32)

    grid = (B // bt, Nq // tq)

    cost = pl.CostEstimate(
        flops=int(2 * B * Nq * Nk * (cb + c)),
        transcendentals=int(B * Nq * Nk),
        bytes_accessed=int(q.size * q.dtype.itemsize
                           + k.size * k.dtype.itemsize
                           + v.size * v.dtype.itemsize
                           + B * c * Nq * jnp.dtype(out_dtype).itemsize
                           + B * Nq * Nk * jnp.dtype(attn_dtype).itemsize))

    out_cm, attn = pl.pallas_call(
        functools.partial(_cross_attn_kernel, scale=scale, exp_dtype=exp_dtype),
        out_shape=(
            jax.ShapeDtypeStruct((B, c, Nq), out_dtype),
            jax.ShapeDtypeStruct((B, Nq, Nk), attn_dtype),
        ),
        grid=grid,
        in_specs=[
            pl.BlockSpec((bt, cb, tq), lambda i, j: (i, 0, j)),
            pl.BlockSpec((bt, cb, Nk), lambda i, j: (i, 0, 0)),  # const across j
            pl.BlockSpec((bt, c, Nk), lambda i, j: (i, 0, 0)),   # const across j
        ],
        out_specs=(
            pl.BlockSpec((bt, c, tq), lambda i, j: (i, 0, j)),
            pl.BlockSpec((bt, tq, Nk), lambda i, j: (i, j, 0)),
        ),
        compiler_params=pltpu.CompilerParams(
            dimension_semantics=("parallel", "parallel"),
            vmem_limit_bytes=vmem_limit,
        ),
        cost_estimate=cost,
    )(q, k, v)

    # (B, c, Nq) -> (b, m, c, H, W): pure reshape, no transpose on the way out.
    out = out_cm.reshape(b, m, c, x_h, x_w)
    return out, attn


def _reference_jax(reference_blocks, reference_feat_blocks, target_feat_blocks,
                   dim_feat=32):
    """Plain-JAX re-implementation of the PyTorch forward, for verification."""
    b, m, c, x_h, x_w = reference_blocks.shape
    _, _, cb, x1_h, x1_w = reference_feat_blocks.shape
    _, _, _, x2_h, x2_w = target_feat_blocks.shape
    B = b * m
    scale = float(dim_feat) ** (-0.5)
    q = target_feat_blocks.reshape(B, cb, x2_h * x2_w).transpose(0, 2, 1)
    k = reference_feat_blocks.reshape(B, cb, x1_h * x1_w).transpose(0, 2, 1)
    v = reference_blocks.reshape(B, c, x_h * x_w).transpose(0, 2, 1)
    sim = jnp.einsum('bid,bjd->bij', q, k) * scale
    attn = jax.nn.softmax(sim, axis=-1)
    out = jnp.einsum('bij,bjd->bid', attn, v)
    out = out.transpose(0, 2, 1).reshape(b, m, c, x_h, x_w)
    return out, attn


if __name__ == "__main__":
    key = jax.random.PRNGKey(0)
    k1, k2, k3 = jax.random.split(key, 3)

    # Small shapes consistent with the module's forward contract:
    b, m = 2, 2
    c, x_h, x_w = 4, 8, 8          # reference blocks (values)
    cb, fh, fw = 32, 8, 8          # feature blocks (q / k), dim_feat = 32

    reference_blocks = jax.random.normal(k1, (b, m, c, x_h, x_w), dtype=jnp.float32)
    reference_feat_blocks = jax.random.normal(k2, (b, m, cb, fh, fw), dtype=jnp.float32)
    target_feat_blocks = jax.random.normal(k3, (b, m, cb, fh, fw), dtype=jnp.float32)

    out, attn = cross_attention2(reference_blocks, reference_feat_blocks,
                                 target_feat_blocks, dim_feat=cb)
    jax.block_until_ready(out)
    jax.block_until_ready(attn)

    out_ref, attn_ref = _reference_jax(reference_blocks, reference_feat_blocks,
                                       target_feat_blocks, dim_feat=cb)
    assert out.shape == (b, m, c, x_h, x_w)
    assert attn.shape == (b * m, fh * fw, fh * fw)
    assert jnp.allclose(out, out_ref, atol=1e-5, rtol=1e-5)
    assert jnp.allclose(attn, attn_ref, atol=1e-5, rtol=1e-5)

    print("KERNEL_OK")
</pallas_src>

<mosaic_0001>
module attributes {stable_mosaic.version = 11 : i64} {
  func.func @_cross_attn_kernel(%arg0: i32, %arg1: i32, %arg2: memref<1x32x64xf32, #tpu.memory_space<vmem>>, %arg3: memref<1x32x64xf32, #tpu.memory_space<vmem>>, %arg4: memref<1x4x64xf32, #tpu.memory_space<vmem>>, %arg5: memref<1x4x64xf32, #tpu.memory_space<vmem>>, %arg6: memref<1x64x64xf32, #tpu.memory_space<vmem>>) attributes {dimension_semantics = [#tpu.dimension_semantics<parallel>, #tpu.dimension_semantics<parallel>], iteration_bounds = array<i64: 4, 1>, scalar_prefetch = 0 : i64, scratch_operands = 0 : i64, tpu.core_type = #tpu.core_type<tc>, window_params = [{transform_indices = @transform_0, window_bounds = array<i64: 1, 32, 64>}, {transform_indices = @transform_1, window_bounds = array<i64: 1, 32, 64>}, {transform_indices = @transform_2, window_bounds = array<i64: 1, 4, 64>}, {transform_indices = @transform_3, window_bounds = array<i64: 1, 4, 64>}, {transform_indices = @transform_4, window_bounds = array<i64: 1, 64, 64>}]} {
    %c0 = arith.constant 0 : index
    %c0_0 = arith.constant 0 : index
    %c0_1 = arith.constant 0 : index
    %0 = vector.load %arg2[%c0, %c0_0, %c0_1] : memref<1x32x64xf32, #tpu.memory_space<vmem>>, vector<1x32x64xf32>
    %c0_2 = arith.constant 0 : index
    %c0_3 = arith.constant 0 : index
    %c0_4 = arith.constant 0 : index
    %1 = vector.load %arg3[%c0_2, %c0_3, %c0_4] : memref<1x32x64xf32, #tpu.memory_space<vmem>>, vector<1x32x64xf32>
    %c0_5 = arith.constant 0 : index
    %c0_6 = arith.constant 0 : index
    %c0_7 = arith.constant 0 : index
    %2 = vector.load %arg4[%c0_5, %c0_6, %c0_7] : memref<1x4x64xf32, #tpu.memory_space<vmem>>, vector<1x4x64xf32>
    %cst = arith.constant dense<0.000000e+00> : vector<1x64x64xf32>
    %3 = tpu.matmul %0, %1, %cst {dimension_numbers = #tpu.dot_dimension_numbers<[1], [1], [2], [2], [0, 0, 0, 2, 1, 2], [0], [0]>} : vector<1x32x64xf32>, vector<1x32x64xf32>, vector<1x64x64xf32> -> vector<1x64x64xf32>
    %cst_8 = arith.constant 0.176776692 : f32
    %4 = vector.broadcast %cst_8 : f32 to vector<1x64x64xf32>
    %5 = arith.mulf %3, %4 : vector<1x64x64xf32>
    %cst_9 = arith.constant dense<0xFF800000> : vector<1x64xf32>
    %6 = vector.multi_reduction <maximumf>, %5, %cst_9 [2] : vector<1x64x64xf32> to vector<1x64xf32>
    %7 = vector.shape_cast %6 : vector<1x64xf32> to vector<1x64x1xf32>
    %8 = vector.broadcast %7 : vector<1x64x1xf32> to vector<1x64x64xf32>
    %9 = arith.subf %5, %8 : vector<1x64x64xf32>
    %10 = math.exp %9 : vector<1x64x64xf32>
    %cst_10 = arith.constant dense<0.000000e+00> : vector<1x64xf32>
    %11 = vector.multi_reduction <add>, %10, %cst_10 [2] : vector<1x64x64xf32> to vector<1x64xf32>
    %12 = vector.shape_cast %11 : vector<1x64xf32> to vector<1x64x1xf32>
    %13 = tpu.reciprocal %12 : vector<1x64x1xf32> -> vector<1x64x1xf32>
    %14 = vector.broadcast %13 : vector<1x64x1xf32> to vector<1x64x64xf32>
    %15 = arith.mulf %10, %14 : vector<1x64x64xf32>
    %c0_11 = arith.constant 0 : index
    %c0_12 = arith.constant 0 : index
    %c0_13 = arith.constant 0 : index
    %16 = vector.load %arg6[%c0_11, %c0_12, %c0_13] : memref<1x64x64xf32, #tpu.memory_space<vmem>>, vector<1x64x64xf32>
    tpu.vector_store %arg6[%c0_11, %c0_12, %c0_13], %15 {strides = array<i32>} : memref<1x64x64xf32, #tpu.memory_space<vmem>>, vector<1x64x64xf32>,
    %cst_14 = arith.constant dense<0.000000e+00> : vector<1x4x64xf32>
    %17 = tpu.matmul %2, %15, %cst_14 {dimension_numbers = #tpu.dot_dimension_numbers<[2], [2], [1], [1], [0, 0, 0, 1, 1, 1], [0], [0]>} : vector<1x4x64xf32>, vector<1x64x64xf32>, vector<1x4x64xf32> -> vector<1x4x64xf32>
    %c0_15 = arith.constant 0 : index
    %c0_16 = arith.constant 0 : index
    %c0_17 = arith.constant 0 : index
    %18 = vector.load %arg5[%c0_15, %c0_16, %c0_17] : memref<1x4x64xf32, #tpu.memory_space<vmem>>, vector<1x4x64xf32>
    tpu.vector_store %arg5[%c0_15, %c0_16, %c0_17], %17 {strides = array<i32>} : memref<1x4x64xf32, #tpu.memory_space<vmem>>, vector<1x4x64xf32>,
    return
  }
  func.func @transform_0(%arg0: i32, %arg1: i32) -> (i32, i32, i32) {
    %c0_i32 = arith.constant 0 : i32
    %c0_i32_0 = arith.constant 0 : i32
    return %arg0, %c0_i32, %arg1 : i32, i32, i32
  }
  func.func @transform_1(%arg0: i32, %arg1: i32) -> (i32, i32, i32) {
    %c0_i32 = arith.constant 0 : i32
    %c0_i32_0 = arith.constant 0 : i32
    %c0_i32_1 = arith.constant 0 : i32
    return %arg0, %c0_i32, %c0_i32_0 : i32, i32, i32
  }
  func.func @transform_2(%arg0: i32, %arg1: i32) -> (i32, i32, i32) {
    %c0_i32 = arith.constant 0 : i32
    %c0_i32_0 = arith.constant 0 : i32
    %c0_i32_1 = arith.constant 0 : i32
    return %arg0, %c0_i32, %c0_i32_0 : i32, i32, i32
  }
  func.func @transform_3(%arg0: i32, %arg1: i32) -> (i32, i32, i32) {
    %c0_i32 = arith.constant 0 : i32
    %c0_i32_0 = arith.constant 0 : i32
    return %arg0, %c0_i32, %arg1 : i32, i32, i32
  }
  func.func @transform_4(%arg0: i32, %arg1: i32) -> (i32, i32, i32) {
    %c0_i32 = arith.constant 0 : i32
    %c0_i32_0 = arith.constant 0 : i32
    return %arg0, %arg1, %c0_i32 : i32, i32, i32
  }
}

</mosaic_0001>

<bundles_post_ra>
// kernel: tpu_custom_call.1
= control target key start
LH: loop header
LB: loop body
LE: loop exit
PB: predicated region body
PF: predicated region fallthrough
CT: control target
= control target key end

     0   :  { %s1635_s0 = inlined_call_operand.hbm [shape: f32[4,32,64], index: 0, kind: input, shape index: {}]   ;;  %s1636_s1 = inlined_call_operand.hbm [shape: f32[4,32,64], index: 1, kind: input, shape index: {}]   ;;  %s1637_s2 = inlined_call_operand.hbm [shape: f32[4,4,64], index: 2, kind: input, shape index: {}]   ;;  %s1638_s3 = inlined_call_operand.hbm [shape: f32[4,4,64], index: 3, kind: output, shape index: {0}]   ;;  %s1639_s4 = inlined_call_operand.hbm [shape: f32[4,64,64], index: 4, kind: output, shape index: {1}]  }
   0x1   :  { %1643 = sst [smem:[#allocation19_spill]] %s1636_s1 }
   0x2   :  { %10 = vsyncpa [#allocation3], 0 }
   0x3   :  { %12 = vsyncpa [#allocation3 + $0x1], 0 }
   0x4   :  { %13 = vsyncpa [#allocation6], 0 }
   0x5   :  { %15 = vsyncpa [#allocation6 + $0x1], 0 }
   0x6   :  { %16 = vsyncpa [#allocation4], 0 }
   0x7   :  { %18 = vsyncpa [#allocation4 + $0x1], 0 }
   0x8   :  { %19 = vsyncpa [#allocation10], 0 }
   0x9   :  { %21 = vsyncpa [#allocation10 + $0x1], 0  ;;  %s1349_s15 = smov 0   ;;  %s1351_s16 = smov 0  }
   0xa   :  { %s1353_s17 = smov 0   ;;  %s1355_s18 = smov 0  }
   0xb   :  { %s1357_s19 = smov 0   ;;  %s1359_s20 = smov 0  }
   0xc LB: > { %1644 = sst [smem:[#allocation15_spill]] %s1299_s17  ;;  %s1380_s21 = sadd.s32 4294967295, %s1311_s20   ;;  %s1311_s20 = sphi %s1359_s20, %s27_s20   ;;  %s1307_s19 = sphi %s1357_s19, %s1662_s19   ;;  %s1303_s18 = sphi %s1355_s18, %s1661_s18   ;;  %s1299_s17 = sphi %s1353_s17, %s1657_s17   ;;  %s1295_s16 = sphi %s1351_s16, %s1660_s16   ;;  %s1291_s15 = sphi %s1349_s15, %s1659_s15  }
   0xd   : > { %s894_s22 = sadd.s32 4294967294, %s1311_s20   ;;  %s39_s23 = sadd.s32 1, %s1307_s19 }
   0xe   : > { %s48_s24 = sadd.s32 1, %s1299_s17  ;;  %p41_p0 = scmp.ge.s32.totalorder %s39_s23, 4 }
   0xf   : > { %p55_p1 = scmp.ne.s32.totalorder %s1299_s17, %s1295_s16  ;;  %p56_p2 = scmp.eq.s32.totalorder %s1311_s20, 0 }
  0x10   : > { %p61_p3 = scmp.ne.s32.totalorder %s1295_s16, %s1291_s15  ;;  %s1664_s23 = smov (%p41_p0, %s39_s23), 0 }
  0x11   : > { %1645 = sst [smem:[#allocation16_spill]] %s1664_s23  ;;  %p1392_p4 = por %p56_p2, %p55_p1 }
  0x12   : > { %p62_p5 = scmp.eq.s32.totalorder %s1380_s21, 0  ;;  %s43_s26 = ssub.s32 %s1307_s19, %s1664_s23 }
  0x13   : > { %p139_p6 = scmp.eq.s32.totalorder %s1380_s21, 3  ;;  %p46_p7 = scmp.eq.s32.totalorder %s43_s26, 0 }
  0x14   : > { %p1400_p8 = por %p62_p5, %p61_p3  ;;  %p145_p10 = scmp.eq.s32.totalorder %s894_s22, 3 }
  0x15   : > { %p1404_p9 = por %p139_p6, %p55_p1  ;;  %p1025_p12 = scmp.lt.s32.totalorder %s1311_s20, 4 }
  0x16   : > { %s1409_s29 = scalar_select %p46_p7, %s1299_s17, %s48_s24  }
  0x17   : > { %p1411_p11 = por %p145_p10, %p61_p3  ;;  %s1417_s5 = sand.u32 1, %s1299_s17  }
  0x18   : > { %1649 = sst [smem:[#allocation17_spill]] %s1409_s29  ;;  %s897_s6 = sshll.u32 %s1417_s5, 5 }
  0x19   : > { %s1650_s30 = scalar_select %p1411_p11, 1, 0 }
  0x1a   : > { %s935_s7 = sshll.u32 %s1307_s19, 9  ;;  %p1423_p13 = pnand %p1025_p12, %p1392_p4 }
  0x1b   : > { %1651 = sst [smem:[#allocation18_spill]] %s1650_s30  ;;  %s215_s9 = sand.u32 1, %s1311_s20  }
  0x1c   : > { %s1653_s1 = sld [smem:[#allocation19_spill]]  ;;  %s219_s13 = scalar_lea.vmem [#allocation5], %s897_s6 }
  0x1d   : > { %s226_s14 = sshll.u32 %s219_s13, 4  ;;  %p905_p0 = scmp.ge.s32.totalorder %s1311_s20, 1  ;;  %s227_s14 = int_to_ptr.vmem [resolvable:$true] %s226_s14 }
  0x1e   : > { %p252_p1 = scmp.lt.s32.totalorder %s1311_s20, 5  ;;  %s1437_s22 = scalar_lea.sflag [#allocation6], %s215_s9 }
  0x1f   : > { %p1115_p2 = pneg %p1423_p13  ;;  %s1126_s24 = scalar_lea.vmem %s227_s14, 512 }
  0x20   : > { %p1127_p3 = scmp.ne.s32.totalorder %s227_s14, %s1126_s24  ;;  %s1313_s25 = smov [#allocation5]  }
  0x21   : > { %s1131_s26 = sshll.u32 %s1313_s25, 4  ;;  %s1132_s26 = int_to_ptr.vmem [resolvable:$false] %s1131_s26 }
  0x22   : > { %s225_s12 = scalar_lea.hbm %s1653_s1, %s935_s7  ;;  %p1129_p4 = pnand %p1127_p3, %p1115_p2 }
  0x23   : > { %s1133_s10 = scalar_lea.vmem %s1132_s26, 1024  ;;  %p1134_p6 = scmp.lt.s32.totalorder %s227_s14, %s1132_s26 }
  0x24   : > { %p1130_p5 = pneg %p1129_p4  ;;  %p1135_p7 = scmp.lt.s32.totalorder %s1133_s10, %s1126_s24 }
  0x26   : > { %p1136_p10 = por %p1135_p7, %p1134_p6 }
  0x28   : > { %p1137_p12 = pnand %p1136_p10, %p1130_p5 }
  0x2a   : > { %1140 = shalt.err (!%p1137_p12)
}
  0x2b   : > { %s1314_s11 = smov 128   ;;  %s1315_s9 = smov 8  }
  0x2c   : > { %1014 = dma.hbm_to_vmem [thread:$0]  (!%p1423_p13), %s225_s12, 512, %s227_s14, %s1437_s22, %s1314_s11, %s1314_s11, %s1315_s9  }
  0x2d   : > { %p1451_p3 = pnand %p905_p0, %p252_p1  ;;  %s204_s26 = scalar_lea.hbm %s1635_s0, %s935_s7 }
  0x2e   : > { %s197_s10 = scalar_lea.vmem [#allocation2], %s897_s6  ;;  %s903_s23 = sshll.u32 %s1417_s5, 2 }
  0x2f   : > { %s205_s1 = sshll.u32 %s197_s10, 4  ;;  %s194_s29 = scalar_lea.sflag [#allocation3], %s1417_s5  ;;  %s206_s1 = int_to_ptr.vmem [resolvable:$true] %s205_s1 }
  0x30   : > { %s1154_s17 = scalar_lea.vmem %s206_s1, 512  ;;  %s1316_s12 = smov [#allocation2]  }
  0x31   : > { %p1155_p4 = scmp.ne.s32.totalorder %s206_s1, %s1154_s17  ;;  %s1159_s14 = sshll.u32 %s1316_s12, 4  ;;  %s1160_s14 = int_to_ptr.vmem [resolvable:$false] %s1159_s14 }
  0x32   : > { %s1161_s30 = scalar_lea.vmem %s1160_s14, 1024  ;;  %p1162_p1 = scmp.lt.s32.totalorder %s206_s1, %s1160_s14 }
  0x33   : > { %p1157_p5 = pnand %p1155_p4, %p1115_p2  ;;  %p1163_p6 = scmp.lt.s32.totalorder %s1161_s30, %s1154_s17 }
  0x35   : > { %p1158_p0 = pneg %p1157_p5  ;;  %p1164_p7 = por %p1163_p6, %p1162_p1 }
  0x37   : > { %p1165_p10 = pnand %p1164_p7, %p1158_p0 }
  0x39   : > { %1168 = shalt.err (!%p1165_p10)
}
  0x3a   : > { %1011 = dma.hbm_to_vmem [thread:$0]  (!%p1423_p13), %s204_s26, 512, %s206_s1, %s194_s29, %s1314_s11, %s1314_s11, %s1315_s9  }
  0x3b   : > { %s904_s5 = sshll.u32 %s1307_s19, 6  ;;  %s240_s6 = scalar_lea.vmem [#allocation7], %s903_s23 }
  0x3c   : > { %s247_s7 = sshll.u32 %s240_s6, 4  ;;  %s245_s10 = scalar_lea.hbm %s1637_s2, %s904_s5  ;;  %s248_s7 = int_to_ptr.vmem [resolvable:$true] %s247_s7 }
  0x3d   : > { %s1182_s12 = scalar_lea.vmem %s248_s7, 64  ;;  %s1317_s17 = smov [#allocation7]  }
  0x3e   : > { %p1183_p12 = scmp.ne.s32.totalorder %s248_s7, %s1182_s12  ;;  %s1187_s30 = sshll.u32 %s1317_s17, 4  ;;  %s1188_s30 = int_to_ptr.vmem [resolvable:$false] %s1187_s30 }
  0x3f   : > { %s1189_s14 = scalar_lea.vmem %s1188_s30, 128  ;;  %p1190_p0 = scmp.lt.s32.totalorder %s248_s7, %s1188_s30 }
  0x40   : > { %p1185_p4 = pnand %p1183_p12, %p1115_p2  ;;  %p1191_p1 = scmp.lt.s32.totalorder %s1189_s14, %s1182_s12 }
  0x42   : > { %p1186_p5 = pneg %p1185_p4  ;;  %p1192_p6 = por %p1191_p1, %p1190_p0 }
  0x44   : > { %p1193_p7 = pnand %p1192_p6, %p1186_p5 }
  0x46   : > { %1196 = shalt.err (!%p1193_p7)
}
  0x47   : > { %1017 = dma.hbm_to_vmem [thread:$0]  (!%p1423_p13), %s245_s10, 64, %s248_s7, %s1437_s22  }
  0x48   : > { %256 = sbr.rel (%p1451_p3) target bundleno = 980 (0x3d4), region = 32  ;;  %s1482_s1 = sand.u32 (!%p1451_p3), 1, %s1295_s16  }
  0x49   : > { %s906_s23 = sshll.u32 (!%p1451_p3), %s1482_s1, 5  ;;  %s259_s29 = scalar_lea.sflag (!%p1451_p3), [#allocation3], %s1482_s1 }
  0x4a   : > { %s262_s11 = scalar_lea.vmem (!%p1451_p3), [#allocation2], %s906_s23 }
  0x4d   : > { %1274 = dma.done.wait (%p1400_p8), %s259_s29, 512  }
  0x4e   : > { %1276 = vsyncadd (%p1400_p8), %s259_s29, 4294966784  ;;  %s267_s8 = sand.u32 1, %s1380_s21   ;;  %s271_s9 = scalar_lea.vmem [#allocation5], %s906_s23 }
  0x4f   : > { %s268_s22 = scalar_lea.sflag [#allocation6], %s267_s8 }
  0x50   : > { %1278 = dma.done.wait (%p1400_p8), %s268_s22, 576  }
  0x51   : > { %1280 = vsyncadd (%p1400_p8), %s268_s22, 4294966720  ;;  %v321_v0 = vld [vmem:[%s262_s11] sm:$0xff]  ;;  %v328_v1 = vld [vmem:[%s271_s9 + $0x18] sm:$0xff]  ;;  %vm362_vm0 = vcmask 261120   ;;  %vm500_vm1 = vcmask 523264   ;;  %vm1319_vm2 = vmmov 0  }
  0x52   : > { %330 = vxpose.xlu0.b32.start [1/4] (short) (narrow) %v321_v0, 64  ;;  %v327_v2 = vld [vmem:[%s271_s9 + $0x10] sm:$0xff]  ;;  %v322_v3 = vld [vmem:[%s262_s11 + $0x8] sm:$0xff]  ;;  %959 = vmatprep.subr.mxu0 %v328_v1  ;;  %v325_v5 = vld [vmem:[%s271_s9] sm:$0xff]  ;;  %s910_s21 = sshll.u32 %s1482_s1, 6  ;;  %s908_s13 = sshll.u32 %s1482_s1, 2 }
  0x53   : > { %960 = vmatpush3.msra.mxu0 %v328_v1  ;;  %v326_v4 = vld [vmem:[%s271_s9 + $0x8] sm:$0xff]  ;;  %v323_v6 = vld [vmem:[%s262_s11 + $0x10] sm:$0xff]  ;;  %v324_v7 = vld [vmem:[%s262_s11 + $0x18] sm:$0xff]  ;;  %s1520_s27 = scalar_lea.vmem [#allocation9], %s910_s21  ;;  %s280_s26 = scalar_lea.vmem [#allocation7], %s908_s13 }
  0x54   : > { %961 = vmatprep.subr.mxu0 %v327_v2  ;;  %s937_s5 = sshll.u32 %s1303_s18, 10  ;;  %s731_s6 = sshll.u32 %s1520_s27, 4  ;;  %s1557_s6 = int_to_ptr.vmem [resolvable:$true] %s731_s6 }
  0x55   : > { %962 = vmatpush3.msra.mxu0 %v327_v2  ;;  %s1555_s25 = scalar_lea.hbm %s1639_s4, %s937_s5  ;;  %s702_s10 = scalar_lea.sflag [#allocation10], %s1482_s1 }
  0x56   : > { %331 = vxpose.xlu0.b32.cont [2/4] (short) (narrow) %v322_v3, 64  ;;  %963 = vmatprep.subr.mxu0 %v326_v4  ;;  %s1197_s12 = scalar_lea.vmem %s1557_s6, 1024  ;;  %s1320_s17 = smov [#allocation9]  }
  0x57   : > { %964 = vmatpush3.msra.mxu0 %v326_v4  ;;  %p1198_p8 = scmp.ne.s32.totalorder %s1557_s6, %s1197_s12  ;;  %s1201_s30 = sshll.u32 %s1320_s17, 4  ;;  %s1202_s30 = int_to_ptr.vmem [resolvable:$false] %s1201_s30 }
  0x58   : > { %965 = vmatprep.subr.mxu0 %v325_v5  ;;  %s1203_s14 = scalar_lea.vmem %s1202_s30, 2048  ;;  %p1204_p3 = scmp.lt.s32.totalorder %s1557_s6, %s1202_s30 }
  0x59   : > { %966 = vmatpush3.msra.mxu0 %v325_v5  ;;  %p1199_p13 = pnand %p1198_p8, %p1404_p9  ;;  %p1205_p10 = scmp.lt.s32.totalorder %s1203_s14, %s1197_s12 }
  0x5a   : > { %332 = vxpose.xlu0.b32.cont [3/4] (short) (narrow) %v323_v6, 64 }
  0x5b   : > { %p1200_p2 = pneg %p1199_p13  ;;  %p1206_p12 = por %p1205_p10, %p1204_p3 }
  0x5d   : > { %p1207_p4 = pnand %p1206_p12, %p1200_p2 }
  0x5e   : > { %333 = vxpose.xlu0.b32.end [4/4] (short) (narrow) %v324_v7, 64 }
  0xce   : > { %v346_v8 = vpop.trf.xlu0 }
  0xcf   : > { %967 = vmatprep.mubr.msk.f32.mxu0 %vm362_vm0, %v346_v8 }
  0xd2   : > { %v347_v9 = vpop.trf.xlu0 }
  0xd3   : > { %968 = vmatmul.mubr.msk.f32.vlgmr.msra.gmra.mxu0 %vm362_vm0, %v347_v9 }
  0xd6   : > { %v348_v10 = vpop.trf.xlu0 }
  0xd7   : > { %970 = vmatprep.mubr.msk.f32.mxu0 %vm362_vm0, %v348_v10 }
  0xda   : > { %v349_v11 = vpop.trf.xlu0 }
  0xdb   : > { %971 = vmatmul.mubr.msk.f32.gmra.mxu0 %vm362_vm0, %v349_v11 }
  0xde   : > { %v350_v12 = vpop.trf.xlu0 }
  0xdf   : > { %973 = vmatprep.mubr.msk.f32.mxu0 %vm362_vm0, %v350_v12 }
  0xe2   : > { %v351_v13 = vpop.trf.xlu0 }
  0xe3   : > { %974 = vmatmul.mubr.msk.f32.gmra.mxu0 %vm362_vm0, %v351_v13 }
  0xe6   : > { %v352_v14 = vpop.trf.xlu0 }
  0xe7   : > { %976 = vmatprep.mubr.msk.f32.mxu0 %vm362_vm0, %v352_v14  ;;  %v1318_v14 = vmov 0.0  }
  0xe8   : > { %979 = vmatprep.subr.mxu1 %v1318_v14  ;;  %995 = vmatprep.mubr.msk.f32.mxu1 %vm1319_vm2, %v1318_v14 }
  0xea   : > { %v353_v15 = vpop.trf.xlu0 }
  0xeb   : > { %977 = vmatmul.mubr.msk.f32.gmra.mxu0 %vm362_vm0, %v353_v15 }
 0x193   : > { %v969_v16 = vpop.f32.mrf.mxu0 }
 0x194   : > { %v493_v35 = vmul.f32 0.17677669, %v969_v16 }
 0x195   : > { %v453_v17 = vpop.f32.mrf.mxu0 }
 0x196   : > { %v492_v37 = vmul.f32 0.17677669, %v453_v17  ;;  %v504_v38 = vsel %vm500_vm1, %v493_v35, -inf }
 0x198   : > { %v501_v39 = vsel %vm500_vm1, %v492_v37, -inf }
 0x19b   : > { %v972_v18 = vpop.f32.mrf.mxu0 }
 0x19c   : > { %v495_v19 = vmul.f32 0.17677669, %v972_v18 }
 0x19d   : > { %v463_v21 = vpop.f32.mrf.mxu0 }
 0x19e   : > { %v510_v20 = vsel %vm500_vm1, %v495_v19, -inf  ;;  %v494_v33 = vmul.f32 0.17677669, %v463_v21 }
 0x19f   : > { %511 = vmax.xlane.f32.xlu0 %v510_v20 }
 0x1a0   : > { %v507_v36 = vsel %vm500_vm1, %v494_v33, -inf }
 0x1a3   : > { %v975_v22 = vpop.f32.mrf.mxu0 }
 0x1a4   : > { %v497_v29 = vmul.f32 0.17677669, %v975_v22 }
 0x1a5   : > { %v473_v23 = vpop.f32.mrf.mxu0 }
 0x1a6   : > { %v496_v31 = vmul.f32 0.17677669, %v473_v23  ;;  %v516_v32 = vsel %vm500_vm1, %v497_v29, -inf }
 0x1a8   : > { %v513_v34 = vsel %vm500_vm1, %v496_v31, -inf }
 0x1ab   : > { %v978_v24 = vpop.f32.mrf.mxu0 }
 0x1ac   : > { %v499_v25 = vmul.f32 0.17677669, %v978_v24 }
 0x1ad   : > { %v483_v26 = vpop.f32.mrf.mxu0 }
 0x1ae   : > { %v498_v27 = vmul.f32 0.17677669, %v483_v26  ;;  %v522_v28 = vsel %vm500_vm1, %v499_v25, -inf }
 0x1af   : > { %523 = vmax.xlane.f32.xlu1 %v522_v28 }
 0x1b0   : > { %v519_v30 = vsel %vm500_vm1, %v498_v27, -inf }
 0x1b3   : > { %520 = vmax.xlane.f32.xlu1 %v519_v30 }
 0x1b7   : > { %517 = vmax.xlane.f32.xlu1 %v516_v32 }
 0x1bb   : > { %514 = vmax.xlane.f32.xlu1 %v513_v34 }
 0x1bf   : > { %508 = vmax.xlane.f32.xlu1 %v507_v36 }
 0x1c3   : > { %505 = vmax.xlane.f32.xlu1 %v504_v38 }
 0x1c7   : > { %502 = vmax.xlane.f32.xlu1 %v501_v39 }
 0x228   : > { %v512_v46 = vpop.xlane.xlu0 %511 }
 0x229   : > { %v528_v49 = vsub.f32 %v495_v19, %v512_v46 }
 0x22b   : > { %v539_v53 = vmul.f32 1.442695, %v528_v49 }
 0x238   : > { %v524_v40 = vpop.xlane.xlu1 %523 }
 0x239   : > { %v532_v41 = vsub.f32 %v499_v25, %v524_v40 }
 0x23b   : > { %v547_v42 = vmul.f32 1.442695, %v532_v41  ;;  %v329_v41 = vld [vmem:[%s280_s26] sm:$0xf] }
 0x23c   : > { %v521_v43 = vpop.xlane.xlu1 %520 }
 0x23d   : > { %1081 = vpow2.f32 %v547_v42  ;;  %v531_v44 = vsub.f32 %v498_v27, %v521_v43 }
 0x23f   : > { %v545_v45 = vmul.f32 1.442695, %v531_v44 }
 0x240   : > { %v518_v47 = vpop.xlane.xlu1 %517 }
 0x241   : > { %1083 = vpow2.f32 %v545_v45  ;;  %v530_v48 = vsub.f32 %v497_v29, %v518_v47 }
 0x243   : > { %v543_v50 = vmul.f32 1.442695, %v530_v48 }
 0x244   : > { %v515_v51 = vpop.xlane.xlu1 %514 }
 0x245   : > { %1085 = vpow2.f32 %v543_v50  ;;  %v529_v52 = vsub.f32 %v496_v31, %v515_v51 }
 0x247   : > { %v541_v54 = vmul.f32 1.442695, %v529_v52 }
 0x248   : > { %v509_v55 = vpop.xlane.xlu1 %508 }
 0x249   : > { %1087 = vpow2.f32 %v541_v54  ;;  %v527_v56 = vsub.f32 %v494_v33, %v509_v55 }
 0x24a   : > { %v1082_v57 = vpop.eup %1081  ;;  %1089 = vpow2.f32 %v539_v53 }
 0x24b   : > { %v537_v58 = vmul.f32 1.442695, %v527_v56  ;;  %v570_v59 = vsel %vm500_vm1, %v1082_v57, 0.0 }
 0x24c   : > { %571 = vadd.xlane.f32.xlu1 %v570_v59  ;;  %v506_v60 = vpop.xlane.xlu1 %505 }
 0x24d   : > { %v526_v61 = vsub.f32 %v493_v35, %v506_v60  ;;  %1091 = vpow2.f32 %v537_v58 }
 0x24e   : > { %v1084_v62 = vpop.eup %1083 }
 0x24f   : > { %v535_v63 = vmul.f32 1.442695, %v526_v61  ;;  %v567_v0 = vsel %vm500_vm1, %v1084_v62, 0.0 }
 0x250   : > { %568 = vadd.xlane.f32.xlu1 %v567_v0  ;;  %v503_v1 = vpop.xlane.xlu1 %502 }
 0x251   : > { %v525_v2 = vsub.f32 %v492_v37, %v503_v1  ;;  %1093 = vpow2.f32 %v535_v63 }
 0x252   : > { %v1086_v3 = vpop.eup %1085 }
 0x253   : > { %v533_v4 = vmul.f32 1.442695, %v525_v2  ;;  %v564_v5 = vsel %vm500_vm1, %v1086_v3, 0.0 }
 0x254   : > { %565 = vadd.xlane.f32.xlu1 %v564_v5 }
 0x255   : > { %1095 = vpow2.f32 %v533_v4 }
 0x256   : > { %v1088_v6 = vpop.eup %1087 }
 0x257   : > { %v561_v7 = vsel %vm500_vm1, %v1088_v6, 0.0  ;;  %v1090_v8 = vpop.eup %1089 }
 0x258   : > { %562 = vadd.xlane.f32.xlu1 %v561_v7  ;;  %v558_v9 = vsel %vm500_vm1, %v1090_v8, 0.0 }
 0x25a   : > { %v1092_v10 = vpop.eup %1091 }
 0x25b   : > { %v555_v11 = vsel %vm500_vm1, %v1092_v10, 0.0 }
 0x25c   : > { %559 = vadd.xlane.f32.xlu1 %v558_v9 }
 0x25e   : > { %v1094_v12 = vpop.eup %1093 }
 0x25f   : > { %v552_v13 = vsel %vm500_vm1, %v1094_v12, 0.0 }
 0x260   : > { %556 = vadd.xlane.f32.xlu1 %v555_v11 }
 0x262   : > { %v1096_v15 = vpop.eup %1095 }
 0x263   : > { %v549_v16 = vsel %vm500_vm1, %v1096_v15, 0.0 }
 0x264   : > { %553 = vadd.xlane.f32.xlu1 %v552_v13 }
 0x268   : > { %550 = vadd.xlane.f32.xlu1 %v549_v16 }
 0x2d5   : > { %v572_v17 = vpop.xlane.xlu1 %571 }
 0x2d6   : > { %1097 = vrcp.f32 %v572_v17 }
 0x2d9   : > { %v569_v18 = vpop.xlane.xlu1 %568 }
 0x2da   : > { %1099 = vrcp.f32 %v569_v18 }
 0x2dd   : > { %v566_v19 = vpop.xlane.xlu1 %565 }
 0x2de   : > { %1101 = vrcp.f32 %v566_v19 }
 0x2e1   : > { %v563_v20 = vpop.xlane.xlu1 %562 }
 0x2e2   : > { %1103 = vrcp.f32 %v563_v20 }
 0x2e3   : > { %v1098_v21 = vpop.eup %1097 }
 0x2e4   : > { %v588_v22 = vmul.f32 %v1098_v21, %v1082_v57 }
 0x2e5   : > { %v560_v23 = vpop.xlane.xlu1 %559 }
 0x2e6   : > { %1105 = vrcp.f32 %v560_v23  ;;  %596 = vst.msk [vmem:[%s1520_s27 + $0x38] sm:$0xff] %vm500_vm1, %v588_v22  ;;  %980 = vmatpush3.xpose.msk.msra.mxu1 %vm500_vm1, %v588_v22 }
 0x2e7   : > { %v1100_v24 = vpop.eup %1099  ;;  %981 = vmatprep.subr.mxu1 %v1318_v14 }
 0x2e8   : > { %v587_v25 = vmul.f32 %v1100_v24, %v1084_v62 }
 0x2e9   : > { %v557_v26 = vpop.xlane.xlu1 %556 }
 0x2ea   : > { %1107 = vrcp.f32 %v557_v26  ;;  %595 = vst.msk [vmem:[%s1520_s27 + $0x30] sm:$0xff] %vm500_vm1, %v587_v25  ;;  %982 = vmatpush3.xpose.msk.msra.mxu1 %vm500_vm1, %v587_v25 }
 0x2eb   : > { %v1102_v27 = vpop.eup %1101  ;;  %983 = vmatprep.subr.mxu1 %v1318_v14 }
 0x2ec   : > { %v586_v28 = vmul.f32 %v1102_v27, %v1086_v3 }
 0x2ed   : > { %v554_v29 = vpop.xlane.xlu1 %553 }
 0x2ee   : > { %1109 = vrcp.f32 %v554_v29  ;;  %594 = vst.msk [vmem:[%s1520_s27 + $0x28] sm:$0xff] %vm500_vm1, %v586_v28  ;;  %984 = vmatpush3.xpose.msk.msra.mxu1 %vm500_vm1, %v586_v28 }
 0x2ef   : > { %v1104_v30 = vpop.eup %1103  ;;  %985 = vmatprep.subr.mxu1 %v1318_v14 }
 0x2f0   : > { %v585_v31 = vmul.f32 %v1104_v30, %v1088_v6 }
 0x2f1   : > { %v551_v32 = vpop.xlane.xlu1 %550 }
 0x2f2   : > { %1111 = vrcp.f32 %v551_v32  ;;  %593 = vst.msk [vmem:[%s1520_s27 + $0x20] sm:$0xff] %vm500_vm1, %v585_v31  ;;  %986 = vmatpush3.xpose.msk.msra.mxu1 %vm500_vm1, %v585_v31 }
 0x2f3   : > { %v1106_v33 = vpop.eup %1105  ;;  %987 = vmatprep.subr.mxu1 %v1318_v14 }
 0x2f4   : > { %v584_v34 = vmul.f32 %v1106_v33, %v1090_v8 }
 0x2f6   : > { %592 = vst.msk [vmem:[%s1520_s27 + $0x18] sm:$0xff] %vm500_vm1, %v584_v34  ;;  %988 = vmatpush3.xpose.msk.msra.mxu1 %vm500_vm1, %v584_v34 }
 0x2f7   : > { %v1108_v35 = vpop.eup %1107  ;;  %989 = vmatprep.subr.mxu1 %v1318_v14 }
 0x2f8   : > { %v583_v36 = vmul.f32 %v1108_v35, %v1092_v10 }
 0x2fa   : > { %591 = vst.msk [vmem:[%s1520_s27 + $0x10] sm:$0xff] %vm500_vm1, %v583_v36  ;;  %990 = vmatpush3.xpose.msk.msra.mxu1 %vm500_vm1, %v583_v36 }
 0x2fb   : > { %v1110_v37 = vpop.eup %1109  ;;  %991 = vmatprep.subr.mxu1 %v1318_v14 }
 0x2fc   : > { %v582_v38 = vmul.f32 %v1110_v37, %v1094_v12 }
 0x2fe   : > { %590 = vst.msk [vmem:[%s1520_s27 + $0x8] sm:$0xff] %vm500_vm1, %v582_v38  ;;  %992 = vmatpush3.xpose.msk.msra.mxu1 %vm500_vm1, %v582_v38 }
 0x2ff   : > { %v1112_v39 = vpop.eup %1111  ;;  %993 = vmatprep.subr.mxu1 %v1318_v14 }
 0x300   : > { %v581_v40 = vmul.f32 %v1112_v39, %v1096_v15 }
 0x302   : > { %589 = vst.msk [vmem:[%s1520_s27] sm:$0xff] %vm500_vm1, %v581_v40  ;;  %994 = vmatpush3.xpose.msk.msra.mxu1 %vm500_vm1, %v581_v40 }
 0x305   : > { %996 = vmatmul.mubr.msk.f32.vlgmr.msra.gmra.mxu1 %vm500_vm1, %v329_v41 }
 0x306   : > { %1210 = shalt.err (!%p1207_p4)
}
 0x307   : > { %s1211_s23 = scalar_lea.hbm %s1555_s25, 1024  ;;  %s1215_s8 = scalar_lea.hbm %s1639_s4, 4096 }
 0x308   : > { %p1212_p5 = scmp.ne.s32.totalorder %s1555_s25, %s1211_s23  ;;  %p1216_p6 = scmp.lt.s32.totalorder %s1555_s25, %s1639_s4 }
 0x309   : > { %p1217_p7 = scmp.lt.s32.totalorder %s1215_s8, %s1211_s23 }
 0x30a   : > { %p1213_p0 = pnand %p1212_p5, %p1404_p9 }
 0x30b   : > { %p1218_p8 = por %p1217_p7, %p1216_p6 }
 0x30c   : > { %p1214_p1 = pneg %p1213_p0 }
 0x30e   : > { %p1219_p13 = pnand %p1218_p8, %p1214_p1 }
 0x310   : > { %1222 = shalt.err (!%p1219_p13)
}
 0x311   : > { %s1321_s21 = smov 128   ;;  %s1322_s27 = smov 8   ;;  %vm694_vm3 = vcmask 519168  }
 0x312   : > { %1005 = dma.vmem_to_hbm [thread:$0]  (%p1404_p9), %s1557_s6, 1024, %s1555_s25, %s702_s10, %s1321_s21, %s1321_s21, %s1322_s27  }
 0x313   : > { %s930_s26 = sshll.u32 %s1303_s18, 6  ;;  %s312_s5 = scalar_lea.vmem [#allocation8], %s908_s13 }
 0x314   : > { %s716_s7 = sshll.u32 %s312_s5, 4  ;;  %s1588_s17 = scalar_lea.hbm %s1638_s3, %s930_s26  ;;  %s1590_s7 = int_to_ptr.vmem [resolvable:$true] %s716_s7 }
 0x315   : > { %s697_s30 = scalar_lea.sflag [#allocation4], %s1482_s1  ;;  %s1223_s6 = scalar_lea.vmem %s1590_s7, 64 }
 0x316   : > { %p1224_p2 = scmp.ne.s32.totalorder %s1590_s7, %s1223_s6  ;;  %s1323_s18 = smov [#allocation8]  }
 0x317   : > { %s1227_s13 = sshll.u32 %s1323_s18, 4  ;;  %s1228_s13 = int_to_ptr.vmem [resolvable:$false] %s1227_s13 }
 0x318   : > { %p1225_p3 = pnand %p1224_p2, %p1404_p9  ;;  %s1229_s25 = scalar_lea.vmem %s1228_s13, 128 }
 0x319   : > { %p1230_p12 = scmp.lt.s32.totalorder %s1590_s7, %s1228_s13  ;;  %p1231_p4 = scmp.lt.s32.totalorder %s1229_s25, %s1223_s6 }
 0x31a   : > { %p1226_p10 = pneg %p1225_p3 }
 0x31b   : > { %p1232_p5 = por %p1231_p4, %p1230_p12 }
 0x31d   : > { %p1233_p0 = pnand %p1232_p5, %p1226_p10 }
 0x3c5   : > { %v690_v42 = vpop.f32.mrf.mxu1 }
 0x3c6   : > { %695 = vst.msk [vmem:[%s312_s5] sm:$0xf] %vm694_vm3, %v690_v42 }
 0x3c7   : > { %v997_v43 = vpop.f32.mrf.mxu1 }
 0x3c8   : > { %1236 = shalt.err (!%p1233_p0)
}
 0x3c9   : > { %s1237_s10 = scalar_lea.hbm %s1588_s17, 64  ;;  %s1241_s23 = scalar_lea.hbm %s1638_s3, 256 }
 0x3ca   : > { %p1238_p1 = scmp.ne.s32.totalorder %s1588_s17, %s1237_s10  ;;  %p1242_p8 = scmp.lt.s32.totalorder %s1588_s17, %s1638_s3 }
 0x3cb   : > { %p1243_p13 = scmp.lt.s32.totalorder %s1241_s23, %s1237_s10 }
 0x3cc   : > { %p1239_p6 = pnand %p1238_p1, %p1404_p9 }
 0x3cd   : > { %p1244_p2 = por %p1243_p13, %p1242_p8 }
 0x3ce   : > { %p1240_p7 = pneg %p1239_p6 }
 0x3d0   : > { %p1245_p3 = pnand %p1244_p2, %p1240_p7 }
 0x3d2   : > { %1248 = shalt.err (!%p1245_p3)
}
 0x3d3   : > { %1004 = dma.vmem_to_hbm [thread:$0]  (%p1404_p9), %s1590_s7, 64, %s1588_s17, %s697_s30  }
 0x3d4 PF: > { %p1026_p10 = scmp.ge.s32.totalorder %s1311_s20, 2  ;;  %s746_s22 = sand.u32 1, %s1291_s15  }
 0x3d5   : > { %s747_s9 = scalar_lea.sflag [#allocation4], %s746_s22 }
 0x3d6   : > { %p1019_p12 = pnand %p1026_p10, %p1411_p11 }
 0x3d8   : > { %p1020_p4 = pneg %p1019_p12 }
 0x3da   : > { %1282 = dma.done.wait (%p1020_p4), %s747_s9, 64  }
 0x3db   : > { %1284 = vsyncadd (%p1020_p4), %s747_s9, 4294967232  ;;  %s756_s21 = scalar_lea.sflag [#allocation10], %s746_s22 }
 0x3dc   : > { %1286 = dma.done.wait (%p1020_p4), %s756_s21, 1024  }
 0x3dd   : > { %1288 = vsyncadd (%p1020_p4), %s756_s21, 4294966272  ;;  %s27_s20 = sadd.s32 1, %s1311_s20   ;;  %s1656_s28 = sld [smem:[#allocation15_spill]] }
 0x3de   : > { %p24_p5 = scmp.ge.s32.totalorder %s27_s20, 6   ;;  %s1657_s17 = sld [smem:[#allocation17_spill]] }
 0x3df   : > { %s1658_s27 = sld [smem:[#allocation16_spill]]  ;;  %s1659_s15 = smov %s1295_s16 }
 0x3e0   : > { %s1661_s18 = smov %s1307_s19 }
 0x3e1   :  { %26 = sbr.rel (!%p24_p5) target bundleno = 12 (0xc), region = 118 }
 0x3e3   : > { %s1660_s16 = smov %s1656_s28 }
 0x3e5   : > { %s1662_s19 = smov %s1658_s27 }
 0x3e6   :  { %761 = vsyncpa [#allocation3], 1 }
 0x3e7   :  { %763 = vsyncpa [#allocation3 + $0x1], 1 }
 0x3e8   :  { %764 = vsyncpa [#allocation6], 1 }
 0x3e9   :  { %766 = vsyncpa [#allocation6 + $0x1], 1 }
 0x3ea   :  { %767 = vsyncpa [#allocation4], 1 }
 0x3eb   :  { %769 = vsyncpa [#allocation4 + $0x1], 1 }
 0x3ec   :  { %770 = vsyncpa [#allocation10], 1 }
 0x3ed   :  { %772 = vsyncpa [#allocation10 + $0x1], 1 }

</bundles_post_ra>
